<compile_context>
chip_gen: v5e
topology: v5e:2x2
jax: 0.10.0
libtpu: 0.0.40
codegen_flags: <defaults>
</compile_context>

<pallas_src>
import functools

import jax
import jax.numpy as jnp
from jax import lax
from jax.experimental import pallas as pl
from jax.experimental.pallas import tpu as pltpu


# ---------------------------------------------------------------------------
# Quaternion linear weight construction (pure glue, plain JAX).
# Matches quaternion_ops.quaternion_linear:
#   W = [[ r,  i,  j,  k],
#        [-i,  r,  k, -j],
#        [-j, -k,  r,  i],
#        [-k,  j, -i,  r]]     (block matrix, in_features x out_features)
#   y = x @ W + b
# ---------------------------------------------------------------------------
def quaternion_weight(r, i, j, k):
    col_r = jnp.concatenate([r, -i, -j, -k], axis=0)
    col_i = jnp.concatenate([i,  r, -k,  j], axis=0)
    col_j = jnp.concatenate([j,  k,  r, -i], axis=0)
    col_k = jnp.concatenate([k, -j,  i,  r], axis=0)
    return jnp.concatenate([col_r, col_i, col_j, col_k], axis=1)


def _round_up(n, m):
    return ((n + m - 1) // m) * m


def _derive_time_chunk(T, Bp, Hp, F, *, in_bytes, budget_bytes=40 << 20, cap=32):
    """Largest divisor of T (<= cap) whose per-chunk VMEM footprint fits the budget.

    Budget is chosen conservatively so the same sizing is valid on v7x
    (64 MiB physical VMEM) as well as v5e/v6e (128 MiB).
    """
    fixed = (F * Hp * in_bytes          # W_wx   (grid-invariant, single copy)
             + Hp * Hp * in_bytes       # W_uh
             + Hp * 4                   # fused bias (f32)
             + Bp * Hp * 4)             # hidden-state scratch (f32)
    best = 1
    for tt in range(1, min(T, cap) + 1):
        if T % tt:
            continue
        foot = (2 * tt * Bp * F * in_bytes    # double-buffered x block
                + 2 * tt * Bp * Hp * 4        # double-buffered out block (f32)
                + fixed)
        if foot <= budget_bytes:
            best = tt
    return best


# ---------------------------------------------------------------------------
# Fused kernel: per-chunk input projection + sequential recurrence.
#   out block rows [t*B : (t+1)*B)  first hold  wx_t = x_t @ W_wx + (b_wx+b_uh),
#   then are overwritten with        h_t  = wx_t + h_{t-1} @ W_uh.
# ---------------------------------------------------------------------------
def _qrnn_kernel(x_ref, wwx_ref, bias_ref, wuh_ref, out_ref, h_ref, *, unroll):
    c = pl.program_id(0)

    @pl.when(c == 0)
    def _():
        h_ref[...] = jnp.zeros_like(h_ref)

    B, _ = h_ref.shape                  # B is padded to a multiple of 8
    tt = x_ref.shape[0] // B

    # --- Fused per-chunk input projection -------------------------------
    # One MXU-shaped (tt*B, F) @ (F, H) matmul, fused bias added once,
    # staged straight into the VMEM-resident output block (no extra buffer,
    # no HBM round trip for the wx intermediate).
    out_ref[...] = (
        jnp.dot(x_ref[...], wwx_ref[...], preferred_element_type=jnp.float32)
        + bias_ref[...]
    ).astype(out_ref.dtype)

    wuh = wuh_ref[...]                  # grid-invariant, loaded once per chunk
    # NOTE: if the bundle dump shows Mosaic re-pushing the RHS each step,
    # switch to pltpu.matmul_push_rhs / matmul_acc_lhs / matmul_pop to pin
    # W_uh in MXU weight registers across the whole unrolled chunk.

    def step(t, h):
        r = pl.multiple_of(t * B, B)    # B multiple of 8 -> aligned sublanes
        wx_t = out_ref[pl.ds(r, B), :].astype(jnp.float32)
        h = wx_t + jnp.dot(h.astype(wuh.dtype), wuh,
                           preferred_element_type=jnp.float32)
        out_ref[pl.ds(r, B), :] = h.astype(out_ref.dtype)
        return h

    # Carry h in f32 vregs within the chunk; unroll capped to bound vreg
    # pressure (a (B,H) carry + many staged stores can spill past 64 vregs).
    h = lax.fori_loop(0, tt, step, h_ref[...], unroll=unroll)
    h_ref[...] = h                      # persists in VMEM across grid steps


def qrnn_forward(x, w_wx, b_wx, w_uh, b_uh, *, tt=None,
                 compute_dtype=jnp.bfloat16):
    """Fused QRNN forward.  Returns (output (T, B, H), h_T (B, H))."""
    T, B, F = x.shape
    H = w_wx.shape[1]
    out_dtype = x.dtype
    in_bytes = jnp.dtype(compute_dtype).itemsize

    # Pad B to a multiple of 8 (sublanes) and H to a multiple of 128 (lanes)
    # so the per-step stores are unmasked lane-dense vst.  Zero padding is
    # exact: padded H lanes stay zero, padded batch rows are sliced off.
    Bp = _round_up(B, 8)
    Hp = _round_up(H, 128)

    xp = jnp.pad(x, ((0, 0), (0, Bp - B), (0, 0))) if Bp != B else x
    wwx = jnp.pad(w_wx, ((0, 0), (0, Hp - H))) if Hp != H else w_wx
    wuh = jnp.pad(w_uh, ((0, Hp - H), (0, Hp - H))) if Hp != H else w_uh
    bias = (b_wx + b_uh).reshape(1, H).astype(jnp.float32)
    if Hp != H:
        bias = jnp.pad(bias, ((0, 0), (0, Hp - H)))

    # bf16 matmul operands, f32 accumulation; flatten (T, Bp, F) -> (T*Bp, F)
    # in the wrapper so the kernel never reshapes.
    x2d = xp.reshape(T * Bp, F).astype(compute_dtype)
    wwx = wwx.astype(compute_dtype)
    wuh = wuh.astype(compute_dtype)

    if tt is None:
        tt = _derive_time_chunk(T, Bp, Hp, F, in_bytes=in_bytes)
    assert T % tt == 0, "time chunk must divide sequence length"
    unroll = min(tt, 8)

    footprint = (2 * tt * Bp * F * in_bytes + 2 * tt * Bp * Hp * 4
                 + F * Hp * in_bytes + Hp * Hp * in_bytes
                 + Hp * 4 + Bp * Hp * 4)
    vmem_limit = int(min(max(2 * footprint, 32 << 20), 48 << 20))

    grid_spec = pltpu.PrefetchScalarGridSpec(
        num_scalar_prefetch=0,
        grid=(T // tt,),
        in_specs=[
            pl.BlockSpec((tt * Bp, F), lambda c: (c, 0)),
            # Grid-invariant weights/bias: whole array, single VMEM copy,
            # never re-DMA'd, not double-buffered (VMEM headroom on v7x).
            pl.BlockSpec(memory_space=pltpu.MemorySpace.VMEM),
            pl.BlockSpec(memory_space=pltpu.MemorySpace.VMEM),
            pl.BlockSpec(memory_space=pltpu.MemorySpace.VMEM),
        ],
        out_specs=pl.BlockSpec((tt * Bp, Hp), lambda c: (c, 0)),
        scratch_shapes=[pltpu.VMEM((Bp, Hp), jnp.float32)],
    )

    out2d = pl.pallas_call(
        functools.partial(_qrnn_kernel, unroll=unroll),
        out_shape=jax.ShapeDtypeStruct((T * Bp, Hp), jnp.float32),
        grid_spec=grid_spec,
        compiler_params=pltpu.CompilerParams(
            dimension_semantics=("arbitrary",),   # sequential recurrence
            vmem_limit_bytes=vmem_limit,
        ),
    )(x2d, wwx, bias, wuh)

    out = out2d.reshape(T, Bp, Hp)[:, :B, :H].astype(out_dtype)
    # Final hidden state is just the last timestep's output.
    return out, out[-1]


# ---------------------------------------------------------------------------
# Pure-JAX reference (mirrors the PyTorch forward) for a correctness check.
# ---------------------------------------------------------------------------
def qrnn_reference(x, w_wx, b_wx, w_uh, b_uh):
    T, B, F = x.shape
    H = w_wx.shape[1]
    wx_out = jnp.einsum("tbf,fh->tbh", x, w_wx) + b_wx
    h = jnp.zeros((B, H), x.dtype)
    outs = []
    for k in range(T):
        h = wx_out[k] + h @ w_uh + b_uh
        outs.append(h)
    return jnp.stack(outs, axis=0), h


if __name__ == "__main__":
    # Small shapes consistent with the module: feat_size and hidden_size are
    # divisible by 4 (quaternion components).
    T, B, F, H = 8, 4, 8, 32

    key = jax.random.PRNGKey(0)
    ks = jax.random.split(key, 11)

    x = jax.random.normal(ks[0], (T, B, F), dtype=jnp.float32)

    # wx: QuaternionLinearAutograd(F, H) -> r/i/j/k weights (F//4, H//4), bias (H,)
    scale_wx = 1.0 / jnp.sqrt(jnp.float32(F))
    r_wx = scale_wx * jax.random.normal(ks[1], (F // 4, H // 4), jnp.float32)
    i_wx = scale_wx * jax.random.normal(ks[2], (F // 4, H // 4), jnp.float32)
    j_wx = scale_wx * jax.random.normal(ks[3], (F // 4, H // 4), jnp.float32)
    k_wx = scale_wx * jax.random.normal(ks[4], (F // 4, H // 4), jnp.float32)
    b_wx = 0.1 * jax.random.normal(ks[5], (1, H), jnp.float32)

    # uh: QuaternionLinearAutograd(H, H) -> r/i/j/k weights (H//4, H//4), bias (H,)
    scale_uh = 1.0 / jnp.sqrt(jnp.float32(H))
    r_uh = scale_uh * jax.random.normal(ks[6], (H // 4, H // 4), jnp.float32)
    i_uh = scale_uh * jax.random.normal(ks[7], (H // 4, H // 4), jnp.float32)
    j_uh = scale_uh * jax.random.normal(ks[8], (H // 4, H // 4), jnp.float32)
    k_uh = scale_uh * jax.random.normal(ks[9], (H // 4, H // 4), jnp.float32)
    b_uh = 0.1 * jax.random.normal(ks[10], (1, H), jnp.float32)

    w_wx = quaternion_weight(r_wx, i_wx, j_wx, k_wx)   # (F, H)
    w_uh = quaternion_weight(r_uh, i_uh, j_uh, k_uh)   # (H, H)

    # tt=4 -> grid of 2 chunks, exercising the fused per-chunk projection and
    # the cross-chunk VMEM-resident hidden-state carry.
    out, h_last = qrnn_forward(x, w_wx, b_wx, w_uh, b_uh, tt=4)
    jax.block_until_ready((out, h_last))

    ref_out, ref_h = qrnn_reference(x, w_wx, b_wx, w_uh, b_uh)
    # bf16 matmul operands with f32 accumulation vs. an all-f32 reference:
    # tolerances loosened accordingly.
    assert jnp.allclose(out, ref_out, atol=1e-1, rtol=5e-2), (
        float(jnp.max(jnp.abs(out - ref_out))))
    assert jnp.allclose(h_last, ref_h, atol=1e-1, rtol=5e-2), (
        float(jnp.max(jnp.abs(h_last - ref_h))))

    print("KERNEL_OK")
</pallas_src>

<mosaic_0001>
module attributes {stable_mosaic.version = 11 : i64} {
  func.func @_qrnn_kernel(%arg0: i32, %arg1: memref<32x8xbf16, #tpu.memory_space<vmem>>, %arg2: memref<8x128xbf16, #tpu.memory_space<vmem>>, %arg3: memref<1x128xf32, #tpu.memory_space<vmem>>, %arg4: memref<128x128xbf16, #tpu.memory_space<vmem>>, %arg5: memref<32x128xf32, #tpu.memory_space<vmem>>, %arg6: memref<8x128xf32, #tpu.memory_space<vmem>>) attributes {dimension_semantics = [#tpu.dimension_semantics<arbitrary>], iteration_bounds = array<i64: 2>, scalar_prefetch = 0 : i64, scratch_operands = 1 : i64, tpu.core_type = #tpu.core_type<tc>, window_params = [{transform_indices = @transform_0, window_bounds = array<i64: 32, 8>}, {pipeline_mode = #tpu.pipeline_mode<synchronous>, transform_indices = @transform_1, window_bounds = array<i64: 8, 128>}, {pipeline_mode = #tpu.pipeline_mode<synchronous>, transform_indices = @transform_2, window_bounds = array<i64: 1, 128>}, {pipeline_mode = #tpu.pipeline_mode<synchronous>, transform_indices = @transform_3, window_bounds = array<i64: 128, 128>}, {transform_indices = @transform_4, window_bounds = array<i64: 32, 128>}]} {
    %c0_i32 = arith.constant 0 : i32
    %0 = arith.cmpi eq, %arg0, %c0_i32 : i32
    %1 = arith.extui %0 : i1 to i32
    %c0_i32_0 = arith.constant 0 : i32
    %2 = arith.cmpi ne, %1, %c0_i32_0 : i32
    scf.if %2 {
      %cst_30 = arith.constant 0.000000e+00 : f32
      %49 = vector.broadcast %cst_30 : f32 to vector<8x128xf32>
      %c0_31 = arith.constant 0 : index
      %c0_32 = arith.constant 0 : index
      %50 = vector.load %arg6[%c0_31, %c0_32] : memref<8x128xf32, #tpu.memory_space<vmem>>, vector<8x128xf32>
      tpu.vector_store %arg6[%c0_31, %c0_32], %49 {strides = array<i32>} : memref<8x128xf32, #tpu.memory_space<vmem>>, vector<8x128xf32>,
    } else {
    }
    %c0 = arith.constant 0 : index
    %c0_1 = arith.constant 0 : index
    %3 = vector.load %arg1[%c0, %c0_1] : memref<32x8xbf16, #tpu.memory_space<vmem>>, vector<32x8xbf16>
    %c0_2 = arith.constant 0 : index
    %c0_3 = arith.constant 0 : index
    %4 = vector.load %arg2[%c0_2, %c0_3] : memref<8x128xbf16, #tpu.memory_space<vmem>>, vector<8x128xbf16>
    %cst = arith.constant dense<0.000000e+00> : vector<32x128xf32>
    %5 = tpu.matmul %3, %4, %cst {dimension_numbers = #tpu.dot_dimension_numbers<[1], [0], [0], [1], [0, 0, 1, 1], [], []>} : vector<32x8xbf16>, vector<8x128xbf16>, vector<32x128xf32> -> vector<32x128xf32>
    %c0_4 = arith.constant 0 : index
    %c0_5 = arith.constant 0 : index
    %6 = vector.load %arg3[%c0_4, %c0_5] : memref<1x128xf32, #tpu.memory_space<vmem>>, vector<1x128xf32>
    %7 = vector.broadcast %6 : vector<1x128xf32> to vector<32x128xf32>
    %8 = arith.addf %5, %7 : vector<32x128xf32>
    %c0_6 = arith.constant 0 : index
    %c0_7 = arith.constant 0 : index
    %9 = vector.load %arg5[%c0_6, %c0_7] : memref<32x128xf32, #tpu.memory_space<vmem>>, vector<32x128xf32>
    tpu.vector_store %arg5[%c0_6, %c0_7], %8 {strides = array<i32>} : memref<32x128xf32, #tpu.memory_space<vmem>>, vector<32x128xf32>,
    %c0_8 = arith.constant 0 : index
    %c0_9 = arith.constant 0 : index
    %10 = vector.load %arg4[%c0_8, %c0_9] : memref<128x128xbf16, #tpu.memory_space<vmem>>, vector<128x128xbf16>
    %c0_10 = arith.constant 0 : index
    %c0_11 = arith.constant 0 : index
    %11 = vector.load %arg6[%c0_10, %c0_11] : memref<8x128xf32, #tpu.memory_space<vmem>>, vector<8x128xf32>
    %c0_i32_12 = arith.constant 0 : i32
    %c8_i32 = arith.constant 8 : i32
    %12 = arith.muli %c0_i32_12, %c8_i32 : i32
    %13 = tpu.assume_multiple %12, 8 : i32
    %14 = arith.index_cast %13 : i32 to index
    %c0_13 = arith.constant 0 : index
    %15 = vector.load %arg5[%14, %c0_13] : memref<32x128xf32, #tpu.memory_space<vmem>>, vector<8x128xf32>
    %16 = arith.truncf %11 : vector<8x128xf32> to vector<8x128xbf16>
    %cst_14 = arith.constant dense<0.000000e+00> : vector<8x128xf32>
    %17 = tpu.matmul %16, %10, %cst_14 {dimension_numbers = #tpu.dot_dimension_numbers<[1], [0], [0], [1], [0, 0, 1, 1], [], []>} : vector<8x128xbf16>, vector<128x128xbf16>, vector<8x128xf32> -> vector<8x128xf32>
    %18 = arith.addf %15, %17 : vector<8x128xf32>
    %19 = arith.index_cast %13 : i32 to index
    %c0_15 = arith.constant 0 : index
    %20 = vector.load %arg5[%19, %c0_15] : memref<32x128xf32, #tpu.memory_space<vmem>>, vector<8x128xf32>
    tpu.vector_store %arg5[%19, %c0_15], %18 {strides = array<i32>} : memref<32x128xf32, #tpu.memory_space<vmem>>, vector<8x128xf32>,
    %c1_i32 = arith.constant 1 : i32
    %c8_i32_16 = arith.constant 8 : i32
    %21 = arith.muli %c1_i32, %c8_i32_16 : i32
    %22 = tpu.assume_multiple %21, 8 : i32
    %23 = arith.index_cast %22 : i32 to index
    %c0_17 = arith.constant 0 : index
    %24 = vector.load %arg5[%23, %c0_17] : memref<32x128xf32, #tpu.memory_space<vmem>>, vector<8x128xf32>
    %25 = arith.truncf %18 : vector<8x128xf32> to vector<8x128xbf16>
    %cst_18 = arith.constant dense<0.000000e+00> : vector<8x128xf32>
    %26 = tpu.matmul %25, %10, %cst_18 {dimension_numbers = #tpu.dot_dimension_numbers<[1], [0], [0], [1], [0, 0, 1, 1], [], []>} : vector<8x128xbf16>, vector<128x128xbf16>, vector<8x128xf32> -> vector<8x128xf32>
    %27 = arith.addf %24, %26 : vector<8x128xf32>
    %28 = arith.index_cast %22 : i32 to index
    %c0_19 = arith.constant 0 : index
    %29 = vector.load %arg5[%28, %c0_19] : memref<32x128xf32, #tpu.memory_space<vmem>>, vector<8x128xf32>
    tpu.vector_store %arg5[%28, %c0_19], %27 {strides = array<i32>} : memref<32x128xf32, #tpu.memory_space<vmem>>, vector<8x128xf32>,
    %c2_i32 = arith.constant 2 : i32
    %c8_i32_20 = arith.constant 8 : i32
    %30 = arith.muli %c2_i32, %c8_i32_20 : i32
    %31 = tpu.assume_multiple %30, 8 : i32
    %32 = arith.index_cast %31 : i32 to index
    %c0_21 = arith.constant 0 : index
    %33 = vector.load %arg5[%32, %c0_21] : memref<32x128xf32, #tpu.memory_space<vmem>>, vector<8x128xf32>
    %34 = arith.truncf %27 : vector<8x128xf32> to vector<8x128xbf16>
    %cst_22 = arith.constant dense<0.000000e+00> : vector<8x128xf32>
    %35 = tpu.matmul %34, %10, %cst_22 {dimension_numbers = #tpu.dot_dimension_numbers<[1], [0], [0], [1], [0, 0, 1, 1], [], []>} : vector<8x128xbf16>, vector<128x128xbf16>, vector<8x128xf32> -> vector<8x128xf32>
    %36 = arith.addf %33, %35 : vector<8x128xf32>
    %37 = arith.index_cast %31 : i32 to index
    %c0_23 = arith.constant 0 : index
    %38 = vector.load %arg5[%37, %c0_23] : memref<32x128xf32, #tpu.memory_space<vmem>>, vector<8x128xf32>
    tpu.vector_store %arg5[%37, %c0_23], %36 {strides = array<i32>} : memref<32x128xf32, #tpu.memory_space<vmem>>, vector<8x128xf32>,
    %c3_i32 = arith.constant 3 : i32
    %c8_i32_24 = arith.constant 8 : i32
    %39 = arith.muli %c3_i32, %c8_i32_24 : i32
    %40 = tpu.assume_multiple %39, 8 : i32
    %41 = arith.index_cast %40 : i32 to index
    %c0_25 = arith.constant 0 : index
    %42 = vector.load %arg5[%41, %c0_25] : memref<32x128xf32, #tpu.memory_space<vmem>>, vector<8x128xf32>
    %43 = arith.truncf %36 : vector<8x128xf32> to vector<8x128xbf16>
    %cst_26 = arith.constant dense<0.000000e+00> : vector<8x128xf32>
    %44 = tpu.matmul %43, %10, %cst_26 {dimension_numbers = #tpu.dot_dimension_numbers<[1], [0], [0], [1], [0, 0, 1, 1], [], []>} : vector<8x128xbf16>, vector<128x128xbf16>, vector<8x128xf32> -> vector<8x128xf32>
    %45 = arith.addf %42, %44 : vector<8x128xf32>
    %46 = arith.index_cast %40 : i32 to index
    %c0_27 = arith.constant 0 : index
    %47 = vector.load %arg5[%46, %c0_27] : memref<32x128xf32, #tpu.memory_space<vmem>>, vector<8x128xf32>
    tpu.vector_store %arg5[%46, %c0_27], %45 {strides = array<i32>} : memref<32x128xf32, #tpu.memory_space<vmem>>, vector<8x128xf32>,
    %c4_i32 = arith.constant 4 : i32
    %c0_28 = arith.constant 0 : index
    %c0_29 = arith.constant 0 : index
    %48 = vector.load %arg6[%c0_28, %c0_29] : memref<8x128xf32, #tpu.memory_space<vmem>>, vector<8x128xf32>
    tpu.vector_store %arg6[%c0_28, %c0_29], %45 {strides = array<i32>} : memref<8x128xf32, #tpu.memory_space<vmem>>, vector<8x128xf32>,
    return
  }
  func.func @transform_0(%arg0: i32) -> (i32, i32) {
    %c0_i32 = arith.constant 0 : i32
    %c0_i32_0 = arith.constant 0 : i32
    return %arg0, %c0_i32 : i32, i32
  }
  func.func @transform_1(%arg0: i32) -> (i32, i32) {
    %c0_i32 = arith.constant 0 : i32
    %c0_i32_0 = arith.constant 0 : i32
    %c0_i32_1 = arith.constant 0 : i32
    return %c0_i32, %c0_i32_0 : i32, i32
  }
  func.func @transform_2(%arg0: i32) -> (i32, i32) {
    %c0_i32 = arith.constant 0 : i32
    %c0_i32_0 = arith.constant 0 : i32
    %c0_i32_1 = arith.constant 0 : i32
    return %c0_i32, %c0_i32_0 : i32, i32
  }
  func.func @transform_3(%arg0: i32) -> (i32, i32) {
    %c0_i32 = arith.constant 0 : i32
    %c0_i32_0 = arith.constant 0 : i32
    %c0_i32_1 = arith.constant 0 : i32
    return %c0_i32, %c0_i32_0 : i32, i32
  }
  func.func @transform_4(%arg0: i32) -> (i32, i32) {
    %c0_i32 = arith.constant 0 : i32
    %c0_i32_0 = arith.constant 0 : i32
    return %arg0, %c0_i32 : i32, i32
  }
}

</mosaic_0001>

<bundles_post_ra>
// kernel: tpu_custom_call.1
= control target key start
LH: loop header
LB: loop body
LE: loop exit
PB: predicated region body
PF: predicated region fallthrough
CT: control target
= control target key end

     0   :  { %9 = vsyncpa [#allocation4], 0  ;;  %s881_s0 = inlined_call_operand.vmem [shape: bf16[64,8], index: 0, kind: input, shape index: {}]   ;;  %s882_s1 = inlined_call_operand.vmem [shape: bf16[8,128], index: 1, kind: input, shape index: {}]   ;;  %s883_s2 = inlined_call_operand.vmem [shape: f32[1,128], index: 2, kind: input, shape index: {}]   ;;  %s884_s3 = inlined_call_operand.hbm [shape: bf16[128,128], index: 3, kind: input, shape index: {}]   ;;  %s885_s4 = inlined_call_operand.hbm [shape: f32[64,128], index: 4, kind: output, shape index: {}]  }
   0x1   :  { %10 = vsyncpa [#allocation5], 0 }
   0x2   :  { %12 = vsyncpa [#allocation5 + $0x1], 0  ;;  %s761_s15 = smov 0   ;;  %s763_s16 = smov 0  }
   0x3   :  { %s765_s17 = smov 0   ;;  %s767_s18 = smov 0  }
   0x4 LB: > { %s782_s19 = sadd.s32 4294967295, %s728_s18   ;;  %s502_s20 = sadd.s32 4294967294, %s728_s18   ;;  %s728_s18 = sphi %s767_s18, %s891_s18   ;;  %s724_s17 = sphi %s765_s17, %s890_s17   ;;  %s720_s16 = sphi %s763_s16, %s889_s16   ;;  %s716_s15 = sphi %s761_s15, %s888_s15  }
   0x5   : > { %s786_s21 = sadd.s32 1, %s728_s18   ;;  %s114_s22 = sadd.s32 1, %s724_s17 }
   0x6   : > { %s111_s23 = ssub.s32 %s728_s18, %s786_s21  ;;  %p124_p0 = scmp.ne.s32.totalorder %s724_s17, %s720_s16 }
   0x7   : > { %p112_p1 = scmp.eq.s32.totalorder %s111_s23, 0  ;;  %p125_p2 = scmp.eq.s32.totalorder %s782_s19, 1 }
   0x8   : > { %p130_p3 = scmp.ne.s32.totalorder %s720_s16, %s716_s15  ;;  %p131_p4 = scmp.eq.s32.totalorder %s502_s20, 1 }
   0x9   : > { %s797_s24 = scalar_select %p112_p1, %s724_s17, %s114_s22  }
   0xa   : > { %p799_p5 = por %p125_p2, %p124_p0  ;;  %p803_p6 = por %p131_p4, %p130_p3 }
   0xb   : > { %p503_p7 = scmp.ge.s32.totalorder %s728_s18, 1  ;;  %p138_p8 = scmp.lt.s32.totalorder %s728_s18, 3 }
   0xc   : > { %p504_p9 = scmp.ne.s32.totalorder %s782_s19, 0  ;;  %p590_p10 = scmp.eq.s32.totalorder %s782_s19, 0 }
   0xd   : > { %p139_p11 = pnand %p503_p7, %p138_p8  ;;  %s155_s29 = sshll.u32 %s884_s3, 4  ;;  %s156_s29 = int_to_ptr.hbm [resolvable:$true] %s155_s29 }
   0xe   : > { %s730_s30 = smov [#allocation3]   ;;  %s731_s6 = smov 64  }
   0xf   : > { %p582_p12 = pneg %p139_p11  ;;  %s157_s5 = sshll.u32 %s730_s30, 4  ;;  %s158_s5 = int_to_ptr.vmem [resolvable:$true] %s157_s5 }
  0x10   : > { %s732_s7 = smov 4   ;;  %182 = sbr.rel (%p139_p11) target bundleno = 599 (0x257), region = 36 }
  0x11   : > { %p583_p13 = pnand %p590_p10, %p582_p12 }
  0x13   : > { %585 = dma.hbm_to_vmem [thread:$0]  (!%p583_p13), %s156_s29, 1024, %s158_s5, [#allocation4], %s731_s6, %s731_s6, %s732_s7  }
  0x15   : > { %707 = dma.done.wait (%p590_p10), [#allocation4], 1024  }
  0x16   : > { %709 = vsyncadd (%p590_p10), [#allocation4], 4294966272  ;;  %s206_s8 = sand.u32 1, %s720_s16   ;;  %s509_s9 = sshll.u32 %s782_s19, 2 }
  0x17   : > { %s508_s10 = sshll.u32 %s206_s8, 5  ;;  %p210_p0 = scmp.lt.s32.totalorder %s509_s9, 7 }
  0x18   : > { %s829_s20 = scalar_lea.vmem [#allocation6], %s508_s10  ;;  %220 = sbr.rel (%p504_p9) target bundleno = 31 (0x1f), region = 44 }
  0x19   : > { %s893_s9 = smov (!%p210_p0, %s509_s9), 7 }
  0x1a   : > { %s510_s11 = sshll.u32 %s893_s9, 2 }
  0x1b   : > { %s827_s14 = scalar_lea.vmem %s881_s0, %s510_s11 }
  0x1d   : > { %v733_v0 = vmov 0.0  }
  0x1e   : > { %221 = vst [vmem:[#allocation2] sm:$0xff] %v733_v0 }
  0x1f PF: > { %v574_v1 = vld [vmem:[#allocation3 + $0x38] sm:$0xff]  ;;  %vm248_vm0 = vcmask 1043456   ;;  %v573_v3 = vld [vmem:[#allocation3 + $0x30] sm:$0xff]  ;;  %vm241_vm1 = vcmask 64512   ;;  %v572_v6 = vld [vmem:[#allocation3 + $0x28] sm:$0xff]  ;;  %s575_s29 = sshll.u32 %s782_s19, 5 }
  0x20   : > { %v226_v2 = vld [vmem:[%s882_s1] sm:$0xf]  ;;  %342 = vmatpush.bf16.msra.mxu1 %v574_v1  ;;  %360 = vmatpush.bf16.msra.mxu2 %v574_v1  ;;  %v571_v7 = vld [vmem:[#allocation3 + $0x20] sm:$0xff]  ;;  %v569_v9 = vld [vmem:[#allocation3 + $0x10] sm:$0xff]  ;;  %s424_s6 = scalar_lea.hbm %s885_s4, %s575_s29  ;;  %s425_s7 = sshll.u32 %s829_s20, 4  ;;  %s426_s7 = int_to_ptr.vmem [resolvable:$true] %s425_s7 }
  0x21   : > { %v250_v4 = vsel %vm248_vm0, %v226_v2, 0  ;;  %v565_v5 = vld [vmem:[%s827_s14] sm:$0xff]  ;;  %378 = vmatpush.bf16.msra.mxu3 %v574_v1  ;;  %v568_v10 = vld [vmem:[#allocation3 + $0x8] sm:$0xff]  ;;  %v567_v11 = vld [vmem:[#allocation3] sm:$0xff]  ;;  %s427_s9 = sshll.u32 %s424_s6, 4  ;;  %s413_s10 = scalar_lea.sflag [#allocation5], %s206_s8  ;;  %s428_s9 = int_to_ptr.hbm [resolvable:$true] %s427_s9 }
  0x22   : > { %259 = vmatpush.bf16.msra.mxu0 %v250_v4  ;;  %v570_v8 = vld [vmem:[#allocation3 + $0x18] sm:$0xff]  ;;  %v566_v14 = vld [vmem:[%s827_s14 + $0x8] sm:$0xff]  ;;  %s676_s11 = sshra.s32 %s428_s9, 4  ;;  %s682_s14 = scalar_lea.hbm %s885_s4, 64  ;;  %s677_s11 = int_to_ptr.hbm [resolvable:$true] %s676_s11 }
  0x23   : > { %v631_v15 = vld [vmem:[%s883_s2] ss:$0 sm:$0xff]  ;;  %s678_s19 = scalar_lea.hbm %s677_s11, 32  ;;  %p683_p4 = scmp.lt.s32.totalorder %s677_s11, %s885_s4 }
  0x24   : > { %343 = vmatpush.bf16.msra.mxu1 %v573_v3  ;;  %361 = vmatpush.bf16.msra.mxu2 %v573_v3  ;;  %p679_p1 = scmp.ne.s32.totalorder %s677_s11, %s678_s19  ;;  %p684_p7 = scmp.lt.s32.totalorder %s682_s14, %s678_s19 }
  0x25   : > { %520 = vmatmul.msk.bf16.vlgmr.msra.gmra.mxu0 %vm241_vm1, %v565_v5  ;;  %379 = vmatpush.bf16.msra.mxu3 %v573_v3  ;;  %v291_v12 = vld [vmem:[#allocation2] sm:$0xff] }
  0x26   : > { %396 = vmatpush.bf16.msrb.mxu0 %v574_v1  ;;  %v293_v13 = vpack.c.bf16 %v291_v12, %v291_v12  ;;  %p680_p2 = pnand %p679_p1, %p799_p5  ;;  %p685_p8 = por %p684_p7, %p683_p4 }
  0x28   : > { %344 = vmatpush.bf16.msra.mxu1 %v572_v6  ;;  %362 = vmatpush.bf16.msra.mxu2 %v572_v6  ;;  %p681_p3 = pneg %p680_p2 }
  0x29   : > { %380 = vmatpush.bf16.msra.mxu3 %v572_v6 }
  0x2a   : > { %397 = vmatpush.bf16.msrb.mxu0 %v573_v3  ;;  %p686_p9 = pnand %p685_p8, %p681_p3 }
  0x2c   : > { %345 = vmatpush.bf16.msra.mxu1 %v571_v7  ;;  %363 = vmatpush.bf16.msra.mxu2 %v571_v7 }
  0x2d   : > { %381 = vmatpush.bf16.msra.mxu3 %v571_v7 }
  0x2e   : > { %398 = vmatpush.bf16.msrb.mxu0 %v572_v6 }
  0x30   : > { %346 = vmatpush.bf16.msra.mxu1 %v570_v8  ;;  %364 = vmatpush.bf16.msra.mxu2 %v570_v8 }
  0x31   : > { %382 = vmatpush.bf16.msra.mxu3 %v570_v8 }
  0x32   : > { %399 = vmatpush.bf16.msrb.mxu0 %v571_v7 }
  0x34   : > { %347 = vmatpush.bf16.msra.mxu1 %v569_v9  ;;  %365 = vmatpush.bf16.msra.mxu2 %v569_v9 }
  0x35   : > { %383 = vmatpush.bf16.msra.mxu3 %v569_v9  ;;  %521 = vmatmul.msk.bf16.gmra.mxu0 %vm241_vm1, %v566_v14 }
  0x36   : > { %400 = vmatpush.bf16.msrb.mxu0 %v570_v8 }
  0x38   : > { %348 = vmatpush.bf16.msra.mxu1 %v568_v10  ;;  %366 = vmatpush.bf16.msra.mxu2 %v568_v10 }
  0x39   : > { %384 = vmatpush.bf16.msra.mxu3 %v568_v10 }
  0x3a   : > { %401 = vmatpush.bf16.msrb.mxu0 %v569_v9 }
  0x3c   : > { %349 = vmatpush.bf16.msra.mxu1 %v567_v11  ;;  %367 = vmatpush.bf16.msra.mxu2 %v567_v11 }
  0x3d   : > { %385 = vmatpush.bf16.msra.mxu3 %v567_v11 }
  0x3e   : > { %402 = vmatpush.bf16.msrb.mxu0 %v568_v10 }
  0x3f   : > { %350 = vmatmul.bf16.vlgmr.msra.gmra.mxu1 %v293_v13 }
  0x42   : > { %403 = vmatpush.bf16.msrb.mxu0 %v567_v11 }
  0xa2   : > { %v261_v16 = vpop.f32.mrf.mxu0 }
  0xa3   : > { %v262_v17 = vadd.f32 %v631_v15, %v261_v16 }
  0xaa   : > { %v263_v22 = vpop.f32.mrf.mxu0 }
  0xab   : > { %v264_v23 = vadd.f32 %v631_v15, %v263_v22 }
  0xb2   : > { %v266_v28 = vpop.f32.mrf.mxu0 }
  0xb3   : > { %v267_v29 = vadd.f32 %v631_v15, %v266_v28 }
  0xba   : > { %v268_v34 = vpop.f32.mrf.mxu0 }
  0xbb   : > { %v269_v35 = vadd.f32 %v631_v15, %v268_v34 }
  0xbc   : > { %v351_v18 = vpop.f32.mrf.mxu1 }
  0xbd   : > { %v355_v19 = vadd.f32 %v351_v18, %v262_v17 }
  0xbf   : > { %356 = vst [vmem:[%s829_s20] sm:$0xff] %v355_v19  ;;  %v359_v20 = vpack.c.bf16 %v355_v19, %v355_v19 }
  0xc1   : > { %368 = vmatmul.bf16.vlgmr.msra.gmra.mxu2 %v359_v20 }
  0xc4   : > { %v353_v21 = vpop.f32.mrf.mxu1 }
 0x144   : > { %v369_v24 = vpop.f32.mrf.mxu2 }
 0x145   : > { %v373_v25 = vadd.f32 %v369_v24, %v264_v23 }
 0x147   : > { %555 = vst [vmem:[%s829_s20 + $0x8] sm:$0xff] %v373_v25  ;;  %v377_v26 = vpack.c.bf16 %v373_v25, %v373_v25 }
 0x149   : > { %386 = vmatmul.bf16.vlgmr.msra.gmra.mxu3 %v377_v26 }
 0x14c   : > { %v371_v27 = vpop.f32.mrf.mxu2 }
 0x1cc   : > { %v387_v30 = vpop.f32.mrf.mxu3 }
 0x1cd   : > { %v391_v31 = vadd.f32 %v387_v30, %v267_v29 }
 0x1cf   : > { %557 = vst [vmem:[%s829_s20 + $0x10] sm:$0xff] %v391_v31  ;;  %v395_v32 = vpack.c.bf16 %v391_v31, %v391_v31 }
 0x1d1   : > { %404 = vmatmul.bf16.vlgmr.msrb.gmra.mxu0 %v395_v32 }
 0x1d4   : > { %v389_v33 = vpop.f32.mrf.mxu3 }
 0x24e   : > { %v405_v36 = vpop.f32.mrf.mxu0 }
 0x24f   : > { %v409_v37 = vadd.f32 %v405_v36, %v269_v35 }
 0x251   : > { %559 = vst [vmem:[%s829_s20 + $0x18] sm:$0xff] %v409_v37 }
 0x252   : > { %411 = vst [vmem:[#allocation2] sm:$0xff] %v409_v37 }
 0x253   : > { %689 = shalt.err (!%p686_p9)
}
 0x254   : > { %s734_s8 = smov 128   ;;  %s735_s20 = smov 8  }
 0x255   : > { %580 = dma.vmem_to_hbm [thread:$0]  (%p799_p5), %s426_s7, 512, %s428_s9, %s413_s10, %s734_s8, %s734_s8, %s735_s20  }
 0x256   : > { %v407_v38 = vpop.f32.mrf.mxu0 }
 0x257 PF: > { %p592_p10 = scmp.ge.s32.totalorder %s728_s18, 2  ;;  %s442_s27 = sand.u32 1, %s716_s15  }
 0x258   : > { %s443_s28 = scalar_lea.sflag [#allocation5], %s442_s27 }
 0x259   : > { %p587_p11 = pnand %p592_p10, %p803_p6 }
 0x25b   : > { %p588_p12 = pneg %p587_p11 }
 0x25d   : > { %711 = dma.done.wait (%p588_p12), %s443_s28, 512  }
 0x25e   : > { %713 = vsyncadd (%p588_p12), %s443_s28, 4294966784  ;;  %p15_p13 = scmp.ge.s32.totalorder %s786_s21, 4   ;;  %s888_s15 = smov %s720_s16 }
 0x25f   : > { %s889_s16 = smov %s724_s17  ;;  %s890_s17 = smov %s797_s24 }
 0x260   : > { %s891_s18 = smov %s786_s21  ;;  %17 = sbr.rel (!%p15_p13) target bundleno = 4 (0x4), region = 83 }
 0x265   :  { %449 = vsyncpa [#allocation4], 1 }
 0x266   :  { %451 = vsyncpa [#allocation4 + $0x1], 1 }
 0x267   :  { %452 = vsyncpa [#allocation5], 1 }
 0x268   :  { %454 = vsyncpa [#allocation5 + $0x1], 1 }

</bundles_post_ra>
